<compile_context>
chip_gen: v6e
topology: v6e:2x2x1
jax: 0.10.0
libtpu: 0.0.40
codegen_flags: <defaults>
</compile_context>

<pallas_src>
import jax
import jax.numpy as jnp
from jax.experimental import pallas as pl
from jax.experimental.pallas import tpu as pltpu


def _round_up(x, m):
    return ((x + m - 1) // m) * m


# Latent rows of the 11-wide MLP head actually used by the inference eta path,
# in kernel row order, and whether each row goes through sigmoid (True) or
# tanh (False).  Rows 5, 6, 7, 10 (C_1, C_2, T_r, beta_shear) are unused:
# ShearRate.forward hard-codes beta = 30.
_USED_ROWS = (0, 1, 2, 3, 4, 8, 9)
_ROW_IS_SIGMOID = (True, True, False, True, False, True, False)


def penn_wlf_kernel(xT_ref, w1_ref, b1_ref, w2_ref, b2_ref, w3_ref, b3_ref,
                    eta_ref):
    F = w1_ref.shape[1]                       # n_fp + 2 (MLP input width)

    # ---- MLP_PENN_PI (eval mode), lane-major: h^T = W h_prev^T + b ----------
    # bf16 operands on the MXU, f32 accumulation, f32 epilogue.
    x_in = xT_ref[0:F, :].astype(jnp.bfloat16)                          # (F, bn)
    h = jnp.dot(w1_ref[...], x_in, preferred_element_type=jnp.float32) + b1_ref[...]
    h = jnp.maximum(h, 0.0).astype(jnp.bfloat16)     # dropout = identity (eval)
    h = jnp.dot(w2_ref[...], h, preferred_element_type=jnp.float32) + b2_ref[...]
    h = jnp.maximum(h, 0.0).astype(jnp.bfloat16)
    p = jnp.dot(w3_ref[...], h, preferred_element_type=jnp.float32) + b3_ref[...]  # (7, bn) f32

    # ---- latent parameter transforms ----------------------------------------
    # The wrapper pre-scaled the sigmoid rows of W3/b3 by 0.5, so a single tanh
    # pass over the 7 used rows serves both sigmoid (0.5*tanh(0.5 z) + 0.5) and
    # tanh rows; the remaining per-row work is cheap VPU affine math.
    t = jnp.tanh(p)                                                     # one EUP pass
    alpha_1    = 1.5 * t[0:1, :] + 1.5          # 3 * sigmoid(p0)
    alpha_2    = 3.0 * t[1:2, :] + 3.0          # 6 * sigmoid(p1)
    k_1        = t[2:3, :] - 0.5                # tanh(p2) - 0.5  (WLF)
    beta_M     = 15.0 * t[3:4, :] + 25.0        # 10 + 30 * sigmoid(p3)
    M_cr       = t[4:5, :]                      # tanh(p4)
    n_exp      = 0.5 * t[5:6, :] + 0.5          # sigmoid(p8)
    crit_shear = t[6:7, :]                      # tanh(p9)

    M = xT_ref[F:F + 1, :]                                              # (1, bn)
    S = xT_ref[F + 1:F + 2, :]                                          # (1, bn)

    # ---- HeavySide blends: both sigmoids in one fused (2, bn) EUP pass ------
    z = jnp.concatenate([beta_M * (M - M_cr),
                         30.0 * (S - crit_shear)], axis=0)              # (2, bn)
    hw = 0.5 * jnp.tanh(0.5 * z) + 0.5          # sigmoid(z); 1 - hw == sigmoid(-z)
    hw_m = hw[0:1, :]
    hw_s = hw[1:2, :]

    # ---- MolWeight layer -----------------------------------------------------
    low_mw  = k_1 + alpha_1 * M
    k_2     = k_1 + (alpha_1 - alpha_2) * M_cr
    high_mw = k_2 + alpha_2 * M
    eta_0   = low_mw * (1.0 - hw_m) + high_mw * hw_m

    # ---- ShearRate layer (beta hard-coded to 30 in the reference) -----------
    high_shear = eta_0 - n_exp * (S - crit_shear)
    eta = eta_0 * (1.0 - hw_s) + high_shear * hw_s                      # (1, bn)

    eta_ref[...] = eta                          # lane-dense (unmasked) store


def visc_penn_pi_wlf_forward(fp, M, S, T, PDI, params, *, block_n=2048):
    """Default (non-train / non-get_constants) path: returns eta of shape (N, 1).

    `params` = (W1, b1, W2, b2, W3, b3) in PyTorch nn.Linear layout:
    weights (out_features, in_features), biases (out_features,).
    `block_n` is the tuned lane-block knob (sweep 2048 / 4096 / 8192 for large N).
    """
    W1, b1, W2, b2, W3, b3 = params
    fp = jnp.asarray(fp, jnp.float32)
    N, n_fp = fp.shape
    F = n_fp + 2
    l1 = W1.shape[0]
    l2 = W2.shape[0]
    lat = W3.shape[0]
    lat_u = len(_USED_ROWS)
    assert W1.shape == (l1, F) and W2.shape == (l2, l1) and W3.shape == (lat, l2)
    assert lat == 11, "Visc_PENN_PI_WLF uses latent_param_size=11"
    assert block_n % 128 == 0 and block_n >= 128

    # No forced second block: plain cdiv.  Clamp the block to the 128-rounded
    # batch so tiny batches run a single small block instead of mostly padding.
    block_n = min(block_n, _round_up(N, 128))
    num_blocks = pl.cdiv(N, block_n)
    n_pad = num_blocks * block_n

    # Single lane-major activation slab [fp^T; PDI^T; T^T; M^T; S^T]:
    # one fused concat/transpose/pad pass in XLA, one activation DMA stream.
    x_all = jnp.concatenate(
        [fp,
         jnp.reshape(PDI, (N, 1)).astype(jnp.float32),
         jnp.reshape(T, (N, 1)).astype(jnp.float32),
         jnp.reshape(M, (N, 1)).astype(jnp.float32),
         jnp.reshape(S, (N, 1)).astype(jnp.float32)], axis=1)            # (N, F+2)
    xT = x_all.T                                                         # (F+2, N)
    if n_pad != N:
        xT = jnp.pad(xT, ((0, 0), (0, n_pad - N)))

    # Weights: bf16 MXU operands (halves vmatmul passes); biases stay f32.
    # Slice W3/b3 to the 7 used rows and fold the 0.5 sigmoid pre-scale into
    # the sigmoid rows (exact in bf16: power-of-two scaling).
    rows = jnp.asarray(_USED_ROWS, dtype=jnp.int32)
    scale = jnp.asarray([0.5 if s else 1.0 for s in _ROW_IS_SIGMOID],
                        dtype=jnp.float32)[:, None]
    W3u = jnp.take(jnp.asarray(W3, jnp.float32), rows, axis=0) * scale   # (7, l2)
    b3u = jnp.take(jnp.asarray(b3, jnp.float32), rows, axis=0)[:, None] * scale

    w1 = jnp.asarray(W1, jnp.float32).astype(jnp.bfloat16)
    w2 = jnp.asarray(W2, jnp.float32).astype(jnp.bfloat16)
    w3 = W3u.astype(jnp.bfloat16)
    b1c = jnp.reshape(b1, (l1, 1)).astype(jnp.float32)
    b2c = jnp.reshape(b2, (l2, 1)).astype(jnp.float32)

    # Weights use a constant block index -> Pallas DMAs them once and keeps
    # them resident across grid steps.
    const = lambda i: (0, 0)
    eta_rows = pl.pallas_call(
        penn_wlf_kernel,
        out_shape=jax.ShapeDtypeStruct((1, n_pad), jnp.float32),
        grid_spec=pltpu.PrefetchScalarGridSpec(
            num_scalar_prefetch=0,
            grid=(num_blocks,),
            in_specs=[
                pl.BlockSpec((F + 2, block_n), lambda i: (0, i)),   # [x^T; M^T; S^T]
                pl.BlockSpec((l1, F), const),                       # W1 (bf16)
                pl.BlockSpec((l1, 1), const),                       # b1 (f32)
                pl.BlockSpec((l2, l1), const),                      # W2 (bf16)
                pl.BlockSpec((l2, 1), const),                       # b2 (f32)
                pl.BlockSpec((lat_u, l2), const),                   # W3 used rows (bf16)
                pl.BlockSpec((lat_u, 1), const),                    # b3 used rows (f32)
            ],
            out_specs=pl.BlockSpec((1, block_n), lambda i: (0, i)),
        ),
        compiler_params=pltpu.CompilerParams(
            dimension_semantics=("parallel",)),
    )(xT, w1, b1c, w2, b2c, w3, b3u)

    return eta_rows[0, :N].reshape(N, 1)


# ----------------------------------------------------------------------------
# Pure-JAX references (eval mode, default eta path)
# ----------------------------------------------------------------------------
def _penn_eta_from_params(p, Mq, Sq):
    sig = jax.nn.sigmoid
    a1 = sig(p[:, 0]) * 3.0
    a2 = sig(p[:, 1]) * 6.0
    k1 = jnp.tanh(p[:, 2]) - 0.5
    bM = 10.0 + sig(p[:, 3]) * 30.0
    Mcr = jnp.tanh(p[:, 4])
    n = sig(p[:, 8])
    Scr = jnp.tanh(p[:, 9])
    low_mw = k1 + a1 * Mq
    k2 = k1 + (a1 - a2) * Mcr
    high_mw = k2 + a2 * Mq
    eta0 = low_mw * sig(bM * (Mcr - Mq)) + high_mw * sig(bM * (Mq - Mcr))
    high_shear = eta0 - n * (Sq - Scr)
    eta = eta0 * sig(30.0 * (Scr - Sq)) + high_shear * sig(30.0 * (Sq - Scr))
    return eta[:, None]


def _reference_forward(fp, M, S, T, PDI, params, *, bf16_matmuls=False):
    """Mirror of Visc_PENN_PI_WLF.forward; optionally with bf16 matmul operands
    (matching the kernel's dtype strategy) for a tight logic check."""
    W1, b1, W2, b2, W3, b3 = params
    cast = (lambda a: a.astype(jnp.bfloat16)) if bf16_matmuls else \
           (lambda a: a.astype(jnp.float32))
    x = jnp.concatenate([fp, PDI, T], axis=1)
    h = jnp.maximum(jnp.dot(cast(x), cast(W1).T,
                            preferred_element_type=jnp.float32) + b1, 0.0)
    h = jnp.maximum(jnp.dot(cast(h), cast(W2).T,
                            preferred_element_type=jnp.float32) + b2, 0.0)
    p = jnp.dot(cast(h), cast(W3).T, preferred_element_type=jnp.float32) + b3
    return _penn_eta_from_params(p, M.reshape(-1), S.reshape(-1))


if __name__ == "__main__":
    # Small shapes consistent with the module (default config l1=l2=120, 11 latents).
    N = 16
    n_fp = 14
    l1, l2 = 120, 120
    latent = 11
    F = n_fp + 2

    key = jax.random.PRNGKey(0)
    ks = jax.random.split(key, 11)

    # Weights in PyTorch nn.Linear layout: (out_features, in_features).
    W1 = jax.random.normal(ks[0], (l1, F), jnp.float32) * (1.0 / jnp.sqrt(F))
    b1 = jax.random.normal(ks[1], (l1,), jnp.float32) * 0.1
    W2 = jax.random.normal(ks[2], (l2, l1), jnp.float32) * (1.0 / jnp.sqrt(l1))
    b2 = jax.random.normal(ks[3], (l2,), jnp.float32) * 0.1
    W3 = jax.random.normal(ks[4], (latent, l2), jnp.float32) * (1.0 / jnp.sqrt(l2))
    b3 = jax.random.normal(ks[5], (latent,), jnp.float32) * 0.1
    params = (W1, b1, W2, b2, W3, b3)

    fp  = jax.random.normal(ks[6], (N, n_fp), jnp.float32)
    M   = jax.random.normal(ks[7], (N, 1), jnp.float32)
    S   = jax.random.normal(ks[8], (N, 1), jnp.float32)
    T   = jax.random.normal(ks[9], (N, 1), jnp.float32)
    PDI = jax.random.normal(ks[10], (N, 1), jnp.float32)

    eta = visc_penn_pi_wlf_forward(fp, M, S, T, PDI, params)   # block_n knob default
    eta = jax.block_until_ready(eta)
    assert eta.shape == (N, 1)

    # Tight check vs a reference that uses the same bf16 matmul operands:
    # validates all layer / latent-row / blend logic (only MXU-vs-XLA
    # accumulation-order rounding remains).
    eta_ref_bf16 = _reference_forward(fp, M, S, T, PDI, params, bf16_matmuls=True)
    err_bf16 = float(jnp.max(jnp.abs(eta - eta_ref_bf16)))
    assert jnp.allclose(eta, eta_ref_bf16, atol=2e-3, rtol=2e-3), \
        f"max abs err vs bf16-matched reference = {err_bf16}"

    # Loose sanity check vs the full-f32 reference: bounds the bf16-operand
    # approximation error (amplified by beta_M <= 40 inside the blends).
    eta_ref_f32 = _reference_forward(fp, M, S, T, PDI, params, bf16_matmuls=False)
    err_f32 = float(jnp.max(jnp.abs(eta - eta_ref_f32)))
    assert err_f32 < 0.2, f"max abs err vs f32 reference = {err_f32}"

    print("KERNEL_OK")
</pallas_src>

<mosaic_0001>
module attributes {stable_mosaic.version = 11 : i64} {
  func.func @penn_wlf_kernel(%arg0: i32, %arg1: memref<18x128xf32, #tpu.memory_space<vmem>>, %arg2: memref<120x16xbf16, #tpu.memory_space<vmem>>, %arg3: memref<120x1xf32, #tpu.memory_space<vmem>>, %arg4: memref<120x120xbf16, #tpu.memory_space<vmem>>, %arg5: memref<120x1xf32, #tpu.memory_space<vmem>>, %arg6: memref<7x120xbf16, #tpu.memory_space<vmem>>, %arg7: memref<7x1xf32, #tpu.memory_space<vmem>>, %arg8: memref<1x128xf32, #tpu.memory_space<vmem>>) attributes {dimension_semantics = [#tpu.dimension_semantics<parallel>], iteration_bounds = array<i64: 1>, scalar_prefetch = 0 : i64, scratch_operands = 0 : i64, tpu.core_type = #tpu.core_type<tc>, window_params = [{transform_indices = @transform_0, window_bounds = array<i64: 18, 128>}, {pipeline_mode = #tpu.pipeline_mode<synchronous>, transform_indices = @transform_1, window_bounds = array<i64: 120, 16>}, {pipeline_mode = #tpu.pipeline_mode<synchronous>, transform_indices = @transform_2, window_bounds = array<i64: 120, 1>}, {pipeline_mode = #tpu.pipeline_mode<synchronous>, transform_indices = @transform_3, window_bounds = array<i64: 120, 120>}, {pipeline_mode = #tpu.pipeline_mode<synchronous>, transform_indices = @transform_4, window_bounds = array<i64: 120, 1>}, {pipeline_mode = #tpu.pipeline_mode<synchronous>, transform_indices = @transform_5, window_bounds = array<i64: 7, 120>}, {pipeline_mode = #tpu.pipeline_mode<synchronous>, transform_indices = @transform_6, window_bounds = array<i64: 7, 1>}, {transform_indices = @transform_7, window_bounds = array<i64: 1, 128>}]} {
    %c0 = arith.constant 0 : index
    %c0_0 = arith.constant 0 : index
    %0 = vector.load %arg1[%c0, %c0_0] : memref<18x128xf32, #tpu.memory_space<vmem>>, vector<16x128xf32>
    %1 = arith.truncf %0 : vector<16x128xf32> to vector<16x128xbf16>
    %c0_1 = arith.constant 0 : index
    %c0_2 = arith.constant 0 : index
    %2 = vector.load %arg2[%c0_1, %c0_2] : memref<120x16xbf16, #tpu.memory_space<vmem>>, vector<120x16xbf16>
    %cst = arith.constant dense<0.000000e+00> : vector<120x128xf32>
    %3 = tpu.matmul %2, %1, %cst {dimension_numbers = #tpu.dot_dimension_numbers<[1], [0], [0], [1], [0, 0, 1, 1], [], []>} : vector<120x16xbf16>, vector<16x128xbf16>, vector<120x128xf32> -> vector<120x128xf32>
    %c0_3 = arith.constant 0 : index
    %c0_4 = arith.constant 0 : index
    %4 = vector.load %arg3[%c0_3, %c0_4] : memref<120x1xf32, #tpu.memory_space<vmem>>, vector<120x1xf32>
    %5 = vector.broadcast %4 : vector<120x1xf32> to vector<120x128xf32>
    %6 = arith.addf %3, %5 : vector<120x128xf32>
    %cst_5 = arith.constant 0.000000e+00 : f32
    %7 = vector.broadcast %cst_5 : f32 to vector<120x128xf32>
    %8 = arith.maximumf %6, %7 : vector<120x128xf32>
    %9 = arith.truncf %8 : vector<120x128xf32> to vector<120x128xbf16>
    %c0_6 = arith.constant 0 : index
    %c0_7 = arith.constant 0 : index
    %10 = vector.load %arg4[%c0_6, %c0_7] : memref<120x120xbf16, #tpu.memory_space<vmem>>, vector<120x120xbf16>
    %cst_8 = arith.constant dense<0.000000e+00> : vector<120x128xf32>
    %11 = tpu.matmul %10, %9, %cst_8 {dimension_numbers = #tpu.dot_dimension_numbers<[1], [0], [0], [1], [0, 0, 1, 1], [], []>} : vector<120x120xbf16>, vector<120x128xbf16>, vector<120x128xf32> -> vector<120x128xf32>
    %c0_9 = arith.constant 0 : index
    %c0_10 = arith.constant 0 : index
    %12 = vector.load %arg5[%c0_9, %c0_10] : memref<120x1xf32, #tpu.memory_space<vmem>>, vector<120x1xf32>
    %13 = vector.broadcast %12 : vector<120x1xf32> to vector<120x128xf32>
    %14 = arith.addf %11, %13 : vector<120x128xf32>
    %cst_11 = arith.constant 0.000000e+00 : f32
    %15 = vector.broadcast %cst_11 : f32 to vector<120x128xf32>
    %16 = arith.maximumf %14, %15 : vector<120x128xf32>
    %17 = arith.truncf %16 : vector<120x128xf32> to vector<120x128xbf16>
    %c0_12 = arith.constant 0 : index
    %c0_13 = arith.constant 0 : index
    %18 = vector.load %arg6[%c0_12, %c0_13] : memref<7x120xbf16, #tpu.memory_space<vmem>>, vector<7x120xbf16>
    %cst_14 = arith.constant dense<0.000000e+00> : vector<7x128xf32>
    %19 = tpu.matmul %18, %17, %cst_14 {dimension_numbers = #tpu.dot_dimension_numbers<[1], [0], [0], [1], [0, 0, 1, 1], [], []>} : vector<7x120xbf16>, vector<120x128xbf16>, vector<7x128xf32> -> vector<7x128xf32>
    %c0_15 = arith.constant 0 : index
    %c0_16 = arith.constant 0 : index
    %20 = vector.load %arg7[%c0_15, %c0_16] : memref<7x1xf32, #tpu.memory_space<vmem>>, vector<7x1xf32>
    %21 = vector.broadcast %20 : vector<7x1xf32> to vector<7x128xf32>
    %22 = arith.addf %19, %21 : vector<7x128xf32>
    %23 = math.tanh %22 : vector<7x128xf32>
    %24 = vector.extract_strided_slice %23 {offsets = [0, 0], sizes = [1, 128], strides = [1, 1]} : vector<7x128xf32> to vector<1x128xf32>
    %cst_17 = arith.constant 1.500000e+00 : f32
    %25 = vector.broadcast %cst_17 : f32 to vector<1x128xf32>
    %26 = arith.mulf %25, %24 : vector<1x128xf32>
    %cst_18 = arith.constant 1.500000e+00 : f32
    %27 = vector.broadcast %cst_18 : f32 to vector<1x128xf32>
    %28 = arith.addf %26, %27 : vector<1x128xf32>
    %29 = vector.extract_strided_slice %23 {offsets = [1, 0], sizes = [1, 128], strides = [1, 1]} : vector<7x128xf32> to vector<1x128xf32>
    %cst_19 = arith.constant 3.000000e+00 : f32
    %30 = vector.broadcast %cst_19 : f32 to vector<1x128xf32>
    %31 = arith.mulf %30, %29 : vector<1x128xf32>
    %cst_20 = arith.constant 3.000000e+00 : f32
    %32 = vector.broadcast %cst_20 : f32 to vector<1x128xf32>
    %33 = arith.addf %31, %32 : vector<1x128xf32>
    %34 = vector.extract_strided_slice %23 {offsets = [2, 0], sizes = [1, 128], strides = [1, 1]} : vector<7x128xf32> to vector<1x128xf32>
    %cst_21 = arith.constant 5.000000e-01 : f32
    %35 = vector.broadcast %cst_21 : f32 to vector<1x128xf32>
    %36 = arith.subf %34, %35 : vector<1x128xf32>
    %37 = vector.extract_strided_slice %23 {offsets = [3, 0], sizes = [1, 128], strides = [1, 1]} : vector<7x128xf32> to vector<1x128xf32>
    %cst_22 = arith.constant 1.500000e+01 : f32
    %38 = vector.broadcast %cst_22 : f32 to vector<1x128xf32>
    %39 = arith.mulf %38, %37 : vector<1x128xf32>
    %cst_23 = arith.constant 2.500000e+01 : f32
    %40 = vector.broadcast %cst_23 : f32 to vector<1x128xf32>
    %41 = arith.addf %39, %40 : vector<1x128xf32>
    %42 = vector.extract_strided_slice %23 {offsets = [4, 0], sizes = [1, 128], strides = [1, 1]} : vector<7x128xf32> to vector<1x128xf32>
    %43 = vector.extract_strided_slice %23 {offsets = [5, 0], sizes = [1, 128], strides = [1, 1]} : vector<7x128xf32> to vector<1x128xf32>
    %cst_24 = arith.constant 5.000000e-01 : f32
    %44 = vector.broadcast %cst_24 : f32 to vector<1x128xf32>
    %45 = arith.mulf %44, %43 : vector<1x128xf32>
    %cst_25 = arith.constant 5.000000e-01 : f32
    %46 = vector.broadcast %cst_25 : f32 to vector<1x128xf32>
    %47 = arith.addf %45, %46 : vector<1x128xf32>
    %48 = vector.extract_strided_slice %23 {offsets = [6, 0], sizes = [1, 128], strides = [1, 1]} : vector<7x128xf32> to vector<1x128xf32>
    %c16 = arith.constant 16 : index
    %c0_26 = arith.constant 0 : index
    %49 = vector.load %arg1[%c16, %c0_26] : memref<18x128xf32, #tpu.memory_space<vmem>>, vector<1x128xf32>
    %c17 = arith.constant 17 : index
    %c0_27 = arith.constant 0 : index
    %50 = vector.load %arg1[%c17, %c0_27] : memref<18x128xf32, #tpu.memory_space<vmem>>, vector<1x128xf32>
    %51 = arith.subf %49, %42 : vector<1x128xf32>
    %52 = arith.mulf %41, %51 : vector<1x128xf32>
    %53 = arith.subf %50, %48 : vector<1x128xf32>
    %cst_28 = arith.constant 3.000000e+01 : f32
    %54 = vector.broadcast %cst_28 : f32 to vector<1x128xf32>
    %55 = arith.mulf %54, %53 : vector<1x128xf32>
    %56 = tpu.concatenate %52, %55 in 0 : vector<1x128xf32>, vector<1x128xf32> -> vector<2x128xf32>
    %cst_29 = arith.constant 5.000000e-01 : f32
    %57 = vector.broadcast %cst_29 : f32 to vector<2x128xf32>
    %58 = arith.mulf %57, %56 : vector<2x128xf32>
    %59 = math.tanh %58 : vector<2x128xf32>
    %cst_30 = arith.constant 5.000000e-01 : f32
    %60 = vector.broadcast %cst_30 : f32 to vector<2x128xf32>
    %61 = arith.mulf %60, %59 : vector<2x128xf32>
    %cst_31 = arith.constant 5.000000e-01 : f32
    %62 = vector.broadcast %cst_31 : f32 to vector<2x128xf32>
    %63 = arith.addf %61, %62 : vector<2x128xf32>
    %64 = vector.extract_strided_slice %63 {offsets = [0, 0], sizes = [1, 128], strides = [1, 1]} : vector<2x128xf32> to vector<1x128xf32>
    %65 = vector.extract_strided_slice %63 {offsets = [1, 0], sizes = [1, 128], strides = [1, 1]} : vector<2x128xf32> to vector<1x128xf32>
    %66 = arith.mulf %28, %49 : vector<1x128xf32>
    %67 = arith.addf %36, %66 : vector<1x128xf32>
    %68 = arith.subf %28, %33 : vector<1x128xf32>
    %69 = arith.mulf %68, %42 : vector<1x128xf32>
    %70 = arith.addf %36, %69 : vector<1x128xf32>
    %71 = arith.mulf %33, %49 : vector<1x128xf32>
    %72 = arith.addf %70, %71 : vector<1x128xf32>
    %cst_32 = arith.constant 1.000000e+00 : f32
    %73 = vector.broadcast %cst_32 : f32 to vector<1x128xf32>
    %74 = arith.subf %73, %64 : vector<1x128xf32>
    %75 = arith.mulf %67, %74 : vector<1x128xf32>
    %76 = arith.mulf %72, %64 : vector<1x128xf32>
    %77 = arith.addf %75, %76 : vector<1x128xf32>
    %78 = arith.subf %50, %48 : vector<1x128xf32>
    %79 = arith.mulf %47, %78 : vector<1x128xf32>
    %80 = arith.subf %77, %79 : vector<1x128xf32>
    %cst_33 = arith.constant 1.000000e+00 : f32
    %81 = vector.broadcast %cst_33 : f32 to vector<1x128xf32>
    %82 = arith.subf %81, %65 : vector<1x128xf32>
    %83 = arith.mulf %77, %82 : vector<1x128xf32>
    %84 = arith.mulf %80, %65 : vector<1x128xf32>
    %85 = arith.addf %83, %84 : vector<1x128xf32>
    %c0_34 = arith.constant 0 : index
    %c0_35 = arith.constant 0 : index
    %86 = vector.load %arg8[%c0_34, %c0_35] : memref<1x128xf32, #tpu.memory_space<vmem>>, vector<1x128xf32>
    tpu.vector_store %arg8[%c0_34, %c0_35], %85 {strides = array<i32>} : memref<1x128xf32, #tpu.memory_space<vmem>>, vector<1x128xf32>,
    return
  }
  func.func @transform_0(%arg0: i32) -> (i32, i32) {
    %c0_i32 = arith.constant 0 : i32
    %c0_i32_0 = arith.constant 0 : i32
    return %c0_i32, %arg0 : i32, i32
  }
  func.func @transform_1(%arg0: i32) -> (i32, i32) {
    %c0_i32 = arith.constant 0 : i32
    %c0_i32_0 = arith.constant 0 : i32
    %c0_i32_1 = arith.constant 0 : i32
    return %c0_i32, %c0_i32_0 : i32, i32
  }
  func.func @transform_2(%arg0: i32) -> (i32, i32) {
    %c0_i32 = arith.constant 0 : i32
    %c0_i32_0 = arith.constant 0 : i32
    %c0_i32_1 = arith.constant 0 : i32
    return %c0_i32, %c0_i32_0 : i32, i32
  }
  func.func @transform_3(%arg0: i32) -> (i32, i32) {
    %c0_i32 = arith.constant 0 : i32
    %c0_i32_0 = arith.constant 0 : i32
    %c0_i32_1 = arith.constant 0 : i32
    return %c0_i32, %c0_i32_0 : i32, i32
  }
  func.func @transform_4(%arg0: i32) -> (i32, i32) {
    %c0_i32 = arith.constant 0 : i32
    %c0_i32_0 = arith.constant 0 : i32
    %c0_i32_1 = arith.constant 0 : i32
    return %c0_i32, %c0_i32_0 : i32, i32
  }
  func.func @transform_5(%arg0: i32) -> (i32, i32) {
    %c0_i32 = arith.constant 0 : i32
    %c0_i32_0 = arith.constant 0 : i32
    %c0_i32_1 = arith.constant 0 : i32
    return %c0_i32, %c0_i32_0 : i32, i32
  }
  func.func @transform_6(%arg0: i32) -> (i32, i32) {
    %c0_i32 = arith.constant 0 : i32
    %c0_i32_0 = arith.constant 0 : i32
    %c0_i32_1 = arith.constant 0 : i32
    return %c0_i32, %c0_i32_0 : i32, i32
  }
  func.func @transform_7(%arg0: i32) -> (i32, i32) {
    %c0_i32 = arith.constant 0 : i32
    %c0_i32_0 = arith.constant 0 : i32
    return %c0_i32, %arg0 : i32, i32
  }
}

</mosaic_0001>

<bundles_post_ra>
// kernel: tpu_custom_call.1
= control target key start
LH: loop header
LB: loop body
LE: loop exit
PB: predicated region body
PF: predicated region fallthrough
CT: control target
= control target key end

     0   :  { %vm174_vm0 = vcmask 130048   ;;  %v947_v4 = vmov 0   ;;  %s1197_s0 = inlined_call_operand.vmem [shape: f32[18,128], index: 0, kind: input, shape index: {}]   ;;  %s1198_s1 = inlined_call_operand.vmem [shape: bf16[120,16], index: 1, kind: input, shape index: {}]   ;;  %s1199_s2 = inlined_call_operand.vmem [shape: f32[120,1], index: 2, kind: input, shape index: {}]   ;;  %s1200_s3 = inlined_call_operand.vmem [shape: bf16[120,120], index: 3, kind: input, shape index: {}]   ;;  %s1201_s4 = inlined_call_operand.vmem [shape: f32[120,1], index: 4, kind: input, shape index: {}]   ;;  %s1202_s5 = inlined_call_operand.vmem [shape: bf16[7,120], index: 5, kind: input, shape index: {}]   ;;  %s1203_s6 = inlined_call_operand.vmem [shape: f32[7,1], index: 6, kind: input, shape index: {}]   ;;  %s1204_s7 = inlined_call_operand.hbm [shape: f32[1,128], index: 7, kind: output, shape index: {}]  }
   0x1   :  { %v28_v0 = vld [vmem:[%s1197_s0] sm:$0xff]  ;;  %v29_v1 = vld [vmem:[%s1197_s0 + $0x8] sm:$0xff]  ;;  %903 = vset.pattern.permute.xlu0 %v947_v4  ;;  %904 = vset.pattern.permute.xlu1 %v947_v4  ;;  %v907_v6 = vld [vmem:[%s1198_s1 + $0x10] sm:$0xff]  }
   0x2   :  { %v30_v2 = vpack.c.bf16 %v29_v1, %v28_v0  ;;  %v905_v3 = vld [vmem:[%s1198_s1] sm:$0xff]   ;;  %v906_v5 = vld [vmem:[%s1198_s1 + $0x8] sm:$0xff]   ;;  %v60_v7 = vld [vmem:[%s1199_s2 + $0x70] sm:$0xff] }
   0x3   :  { %830 = vmatprep.mubr.msk.bf16.mxu0 %vm174_vm0, %v905_v3  ;;  %133 = vperm.xlu0 %903, %v60_v7   ;;  %v59_v8 = vld [vmem:[%s1199_s2 + $0x68] sm:$0xff]  ;;  %v58_v9 = vld [vmem:[%s1199_s2 + $0x60] sm:$0xff]  ;;  %v908_v10 = vld [vmem:[%s1198_s1 + $0x18] sm:$0xff]  }
   0x4   :  { %828 = vmatprep.subr.bf16.mxu0 %v30_v2  ;;  %128 = vperm.xlu1 %904, %v59_v8   ;;  %v56_v11 = vld [vmem:[%s1199_s2 + $0x50] sm:$0xff]  ;;  %v909_v12 = vld [vmem:[%s1198_s1 + $0x20] sm:$0xff]   ;;  %v57_v13 = vld [vmem:[%s1199_s2 + $0x58] sm:$0xff] }
   0x5   :  { %829 = vmatpush3.bf16.msra.mxu0 %v30_v2  ;;  %v54_v14 = vld [vmem:[%s1199_s2 + $0x40] sm:$0xff]  ;;  %v910_v15 = vld [vmem:[%s1198_s1 + $0x28] sm:$0xff]   ;;  %v911_v16 = vld [vmem:[%s1198_s1 + $0x30] sm:$0xff]  }
   0x6   :  { %v55_v17 = vld [vmem:[%s1199_s2 + $0x48] sm:$0xff]  ;;  %v52_v18 = vld [vmem:[%s1199_s2 + $0x30] sm:$0xff]  ;;  %v53_v19 = vld [vmem:[%s1199_s2 + $0x38] sm:$0xff] }
   0x7   :  { %123 = vperm.xlu0 %903, %v58_v9   ;;  %v50_v20 = vld [vmem:[%s1199_s2 + $0x20] sm:$0xff] }
   0x8   :  { %831 = vmatmul.mubr.msk.bf16.vlgmr.msra.gmra.mxu0 %vm174_vm0, %v906_v5  ;;  %113 = vperm.xlu1 %904, %v56_v11  }
   0x9   :  { %834 = vmatprep.mubr.msk.bf16.mxu0 %vm174_vm0, %v907_v6 }
   0xb   :  { %118 = vperm.xlu0 %903, %v57_v13  }
   0xc   :  { %103 = vperm.xlu1 %904, %v54_v14  }
   0xf   :  { %108 = vperm.xlu0 %903, %v55_v17  }
  0x10   :  { %835 = vmatmul.mubr.msk.bf16.gmra.mxu0 %vm174_vm0, %v908_v10  ;;  %93 = vperm.xlu1 %904, %v52_v18  }
  0x11   :  { %838 = vmatprep.mubr.msk.bf16.mxu0 %vm174_vm0, %v909_v12 }
  0x18   :  { %839 = vmatmul.mubr.msk.bf16.gmra.mxu0 %vm174_vm0, %v910_v15 }
  0x19   :  { %12 = vsyncpa [#allocation3], 0  ;;  %842 = vmatprep.mubr.msk.bf16.mxu0 %vm174_vm0, %v911_v16  ;;  %98 = vperm.xlu0 %903, %v53_v19   ;;  %v51_v21 = vld [vmem:[%s1199_s2 + $0x28] sm:$0xff]  ;;  %v912_v22 = vld [vmem:[%s1198_s1 + $0x38] ss:$0 sps:$4 sm:$0xff]   ;;  %vm461_vm1 = vcmask 982016  }
  0x1a   :  { %83 = vperm.xlu1 %904, %v50_v20   ;;  %v48_v23 = vld [vmem:[%s1199_s2 + $0x10] sm:$0xff]  ;;  %v49_v24 = vld [vmem:[%s1199_s2 + $0x18] sm:$0xff]  ;;  %v46_v25 = vld [vmem:[%s1199_s2] sm:$0xff]  ;;  %vm486_vm2 = vcmask 1043456   ;;  %vm949_vm3 = vmmov 0   ;;  %vm692_vm4 = vcmask 1040384  }
  0x1b   :  { %v47_v26 = vld [vmem:[%s1199_s2 + $0x8] sm:$0xff]  ;;  %v347_v27 = vld [vmem:[%s1201_s4 + $0x70] sm:$0xff]  ;;  %v345_v28 = vld [vmem:[%s1201_s4 + $0x60] sm:$0xff] }
  0x1c   :  { %v346_v29 = vld [vmem:[%s1201_s4 + $0x68] sm:$0xff]  ;;  %v343_v30 = vld [vmem:[%s1201_s4 + $0x50] sm:$0xff]  ;;  %v344_v31 = vld [vmem:[%s1201_s4 + $0x58] sm:$0xff] }
  0x1d   :  { %88 = vperm.xlu0 %903, %v51_v21   ;;  %v341_v32 = vld [vmem:[%s1201_s4 + $0x40] sm:$0xff]  ;;  %v342_v33 = vld [vmem:[%s1201_s4 + $0x48] sm:$0xff]  ;;  %v339_v34 = vld [vmem:[%s1201_s4 + $0x30] sm:$0xff] }
  0x1e   :  { %73 = vperm.xlu1 %904, %v48_v23   ;;  %v340_v35 = vld [vmem:[%s1201_s4 + $0x38] sm:$0xff]  ;;  %v337_v36 = vld [vmem:[%s1201_s4 + $0x20] sm:$0xff]  ;;  %v338_v37 = vld [vmem:[%s1201_s4 + $0x28] sm:$0xff] }
  0x1f   :  { %v335_v38 = vld [vmem:[%s1201_s4 + $0x10] sm:$0xff]  ;;  %v336_v39 = vld [vmem:[%s1201_s4 + $0x18] sm:$0xff]  ;;  %v333_v40 = vld [vmem:[%s1201_s4] sm:$0xff] }
  0x20   :  { %843 = vmatmul.mubr.msk.bf16.gmra.mxu0 %vm174_vm0, %v912_v22  ;;  %v334_v41 = vld [vmem:[%s1201_s4 + $0x8] sm:$0xff]  ;;  %v610_v42 = vld [vmem:[%s1203_s6] sm:$0x7f] }
  0x21   :  { %78 = vperm.xlu0 %903, %v49_v24   ;;  %v913_v43 = vld [vmem:[%s1200_s3] sm:$0xff]  }
  0x22   :  { %63 = vperm.xlu1 %904, %v46_v25   ;;  %862 = vmatprep.mubr.msk.bf16.mxu1 %vm461_vm1, %v913_v43 }
  0x25   :  { %68 = vperm.xlu0 %903, %v47_v26  }
  0x26   :  { %420 = vperm.xlu1 %904, %v347_v27  }
  0x29   :  { %410 = vperm.xlu0 %903, %v345_v28  }
  0x2a   :  { %415 = vperm.xlu1 %904, %v346_v29  }
  0x2d   :  { %400 = vperm.xlu0 %903, %v343_v30  }
  0x2e   :  { %405 = vperm.xlu1 %904, %v344_v31  }
  0x31   :  { %390 = vperm.xlu0 %903, %v341_v32  }
  0x32   :  { %395 = vperm.xlu1 %904, %v342_v33  }
  0x35   :  { %380 = vperm.xlu0 %903, %v339_v34  }
  0x36   :  { %385 = vperm.xlu1 %904, %v340_v35  }
  0x39   :  { %370 = vperm.xlu0 %903, %v337_v36  }
  0x3a   :  { %375 = vperm.xlu1 %904, %v338_v37  }
  0x3d   :  { %360 = vperm.xlu0 %903, %v335_v38  }
  0x3e   :  { %365 = vperm.xlu1 %904, %v336_v39  }
  0x41   :  { %350 = vperm.xlu0 %903, %v333_v40  }
  0x42   :  { %355 = vperm.xlu1 %904, %v334_v41  }
  0x45   :  { %613 = vperm.xlu0 %903, %v610_v42  }
  0x7e   :  { %v134_v47 = vpop.permute.xlu0 %133 }
  0x7f   :  { %v129_v53 = vpop.permute.xlu1 %128 }
  0x82   :  { %v124_v51 = vpop.permute.xlu0 %123 }
  0x83   :  { %v114_v58 = vpop.permute.xlu1 %113 }
  0x86   :  { %v119_v56 = vpop.permute.xlu0 %118 }
  0x87   :  { %v104_v0 = vpop.permute.xlu1 %103 }
  0x8a   :  { %v109_v61 = vpop.permute.xlu0 %108 }
  0x8b   :  { %v94_v12 = vpop.permute.xlu1 %93 }
  0x94   :  { %v99_v7 = vpop.permute.xlu0 %98 }
  0x95   :  { %v84_v24 = vpop.permute.xlu1 %83 }
  0x98   :  { %v89_v20 = vpop.permute.xlu0 %88 }
  0x99   :  { %v74_v33 = vpop.permute.xlu1 %73 }
  0x9c   :  { %v79_v30 = vpop.permute.xlu0 %78 }
  0x9d   :  { %v64_v43 = vpop.permute.xlu1 %63 }
  0xa0   :  { %v69_v39 = vpop.permute.xlu0 %68 }
  0xc8   :  { %v1126_v44 = vpop.f32.mrf.mxu0 }
  0xc9   :  { %v242_v37 = vadd.f32 %v1126_v44, %v74_v33  ;;  %v914_v44 = vld [vmem:[%s1200_s3 + $0x8] sm:$0xff]  }
  0xca   :  { %v1128_v45 = vpop.f32.mrf.mxu0 }
  0xcc   :  { %v833_v46 = vpop.f32.mrf.mxu0 }
  0xcd   :  { %v245_v34 = vadd.f32 %v833_v46, %v79_v30 }
  0xce   :  { %v1130_v48 = vpop.f32.mrf.mxu0 }
  0xcf   :  { %v298_v40 = vmax.f32 %v245_v34, 0.0  ;;  %v237_v41 = vadd.f32 %v1130_v48, %v69_v39  ;;  %v915_v48 = vld [vmem:[%s1200_s3 + $0x10] sm:$0xff]  }
  0xd0   :  { %v836_v49 = vpop.f32.mrf.mxu0 }
  0xd1   :  { %v258_v25 = vadd.f32 %v836_v49, %v94_v12  ;;  %v234_v49 = vadd.f32 %v1128_v45, %v64_v43  ;;  %v296_v46 = vmax.f32 %v237_v41, 0.0  ;;  %v916_v45 = vld [vmem:[%s1200_s3 + $0x18] sm:$0xff]  }
  0xd2   :  { %v249_v50 = vpop.f32.mrf.mxu0 }
  0xd3   :  { %v301_v31 = vmax.f32 %v258_v25, 0.0  ;;  %v250_v32 = vadd.f32 %v249_v50, %v84_v24 }
  0xd4   :  { %v837_v52 = vpop.f32.mrf.mxu0 }
  0xd5   :  { %v261_v21 = vadd.f32 %v837_v52, %v99_v7  ;;  %v299_v38 = vmax.f32 %v250_v32, 0.0 }
  0xd6   :  { %v252_v54 = vpop.f32.mrf.mxu0 }
  0xd7   :  { %v302_v27 = vmax.f32 %v261_v21, 0.0  ;;  %v253_v28 = vadd.f32 %v252_v54, %v89_v20  ;;  %v918_v54 = vld [vmem:[%s1200_s3 + $0x28] sm:$0xff]  }
  0xd8   :  { %v840_v55 = vpop.f32.mrf.mxu0 }
  0xd9   :  { %v274_v9 = vadd.f32 %v840_v55, %v114_v58  ;;  %v313_v35 = vpack.c.bf16 %v302_v27, %v301_v31  ;;  %v300_v36 = vmax.f32 %v253_v28, 0.0  ;;  %v919_v55 = vld [vmem:[%s1200_s3 + $0x30] sm:$0xff]  }
  0xda   :  { %v265_v57 = vpop.f32.mrf.mxu0 }
  0xdb   :  { %v305_v17 = vmax.f32 %v274_v9, 0.0  ;;  %v266_v18 = vadd.f32 %v265_v57, %v104_v0  ;;  %v312_v42 = vpack.c.bf16 %v300_v36, %v299_v38  ;;  %v948_v57 = vmov 0.0  }
  0xdc   :  { %v841_v59 = vpop.f32.mrf.mxu0  ;;  %878 = vmatprep.subr.bf16.mxu0 %v948_v57  ;;  %894 = vmatprep.mubr.msk.bf16.mxu0 %vm949_vm3, %v948_v57 }
  0xdd   :  { %v277_v4 = vadd.f32 %v841_v59, %v119_v56  ;;  %v303_v26 = vmax.f32 %v266_v18, 0.0  ;;  %v920_v56 = vld [vmem:[%s1200_s3 + $0x38] ss:$0 sps:$4 sm:$0xff]  }
  0xde   :  { %v268_v60 = vpop.f32.mrf.mxu0 }
  0xdf   :  { %v306_v13 = vmax.f32 %v277_v4, 0.0  ;;  %v269_v14 = vadd.f32 %v268_v60, %v109_v61  ;;  %v411_v4 = vpop.permute.xlu0 %410 }
  0xe0   :  { %v844_v62 = vpop.f32.mrf.mxu0 }
  0xe1   :  { %v290_v63 = vadd.f32 %v844_v62, %v134_v47  ;;  %v315_v22 = vpack.c.bf16 %v306_v13, %v305_v17  ;;  %v304_v23 = vmax.f32 %v269_v14, 0.0  ;;  %v297_v47 = vmax.f32 %v242_v37, 0.0  ;;  %v421_v62 = vpop.permute.xlu1 %420 }
  0xe2   :  { %v281_v1 = vpop.f32.mrf.mxu0 }
  0xe3   :  { %v309_v2 = vmax.f32 %v290_v63, 0.0  ;;  %v282_v5 = vadd.f32 %v281_v1, %v124_v51  ;;  %v314_v29 = vpack.c.bf16 %v304_v23, %v303_v26  ;;  %v311_v50 = vpack.c.bf16 %v298_v40, %v297_v47  ;;  %v401_v9 = vpop.permute.xlu0 %400 }
  0xe4   :  { %v845_v3 = vpop.f32.mrf.mxu0  ;;  %v295_v51 = vmax.f32 %v234_v49, 0.0 }
  0xe5   :  { %v317_v6 = vpack.c.bf16 %v309_v2, %v309_v2  ;;  %v307_v15 = vmax.f32 %v282_v5, 0.0  ;;  %v416_v2 = vpop.permute.xlu1 %415 }
  0xe6   :  { %v284_v8 = vpop.f32.mrf.mxu0  ;;  %v310_v52 = vpack.c.bf16 %v296_v46, %v295_v51 }
  0xe7   :  { %v285_v10 = vadd.f32 %v284_v8, %v129_v53  ;;  %898 = vmatprep.subr.msk.bf16.mxu1 %vm486_vm2, %v317_v6  ;;  %v488_v11 = vsel %vm486_vm2, %v317_v6, 0  ;;  %v917_v53 = vld [vmem:[%s1200_s3 + $0x20] sm:$0xff]  }
  0xe8   :  { %847 = vmatpush3.bf16.msra.mxu1 %v488_v11 }
  0xe9   :  { %v308_v16 = vmax.f32 %v285_v10, 0.0  ;;  %v406_v7 = vpop.permute.xlu1 %405 }
  0xeb   :  { %v316_v19 = vpack.c.bf16 %v308_v16, %v307_v15  ;;  %v391_v16 = vpop.permute.xlu0 %390 }
  0xed   :  { %848 = vmatprep.subr.bf16.mxu1 %v316_v19  ;;  %v396_v13 = vpop.permute.xlu1 %395 }
  0xee   :  { %849 = vmatpush3.bf16.msra.mxu1 %v316_v19 }
  0xef   :  { %850 = vmatprep.subr.bf16.mxu1 %v315_v22  ;;  %v381_v28 = vpop.permute.xlu0 %380 }
  0xf1   :  { %v386_v24 = vpop.permute.xlu1 %385 }
  0xf2   :  { %851 = vmatpush3.bf16.msra.mxu1 %v315_v22 }
  0xf3   :  { %852 = vmatprep.subr.bf16.mxu1 %v314_v29  ;;  %v371_v38 = vpop.permute.xlu0 %370 }
  0xf5   :  { %v376_v34 = vpop.permute.xlu1 %375 }
  0xf6   :  { %853 = vmatpush3.bf16.msra.mxu1 %v314_v29 }
  0xf7   :  { %854 = vmatprep.subr.bf16.mxu1 %v313_v35  ;;  %v361_v46 = vpop.permute.xlu0 %360 }
  0xf9   :  { %v366_v47 = vpop.permute.xlu1 %365 }
  0xfa   :  { %855 = vmatpush3.bf16.msra.mxu1 %v313_v35 }
  0xfb   :  { %856 = vmatprep.subr.bf16.mxu1 %v312_v42 }
  0xfe   :  { %857 = vmatpush3.bf16.msra.mxu1 %v312_v42 }
  0xff   :  { %858 = vmatprep.subr.bf16.mxu1 %v311_v50 }
 0x102   :  { %859 = vmatpush3.bf16.msra.mxu1 %v311_v50 }
 0x103   :  { %860 = vmatprep.subr.bf16.mxu1 %v310_v52 }
 0x106   :  { %861 = vmatpush3.bf16.msra.mxu1 %v310_v52 }
 0x109   :  { %863 = vmatmul.mubr.msk.bf16.vlgmr.msra.gmra.mxu1 %vm461_vm1, %v914_v44 }
 0x10a   :  { %866 = vmatprep.mubr.msk.bf16.mxu1 %vm461_vm1, %v915_v48 }
 0x111   :  { %867 = vmatmul.mubr.msk.bf16.gmra.mxu1 %vm461_vm1, %v916_v45 }
 0x112   :  { %870 = vmatprep.mubr.msk.bf16.mxu1 %vm461_vm1, %v917_v53  ;;  %v356_v53 = vpop.permute.xlu1 %355 }
 0x119   :  { %871 = vmatmul.mubr.msk.bf16.gmra.mxu1 %vm461_vm1, %v918_v54 }
 0x11a   :  { %874 = vmatprep.mubr.msk.bf16.mxu1 %vm461_vm1, %v919_v55 }
 0x121   :  { %875 = vmatmul.mubr.msk.bf16.gmra.mxu1 %vm461_vm1, %v920_v56 }
 0x1c9   :  { %v1167_v58 = vpop.f32.mrf.mxu1 }
 0x1ca   :  { %v533_v48 = vadd.f32 %v1167_v58, %v361_v46 }
 0x1cb   :  { %v1169_v59 = vpop.f32.mrf.mxu1 }
 0x1cd   :  { %v865_v60 = vpop.f32.mrf.mxu1 }
 0x1ce   :  { %v536_v51 = vadd.f32 %v865_v60, %v366_v47 }
 0x1cf   :  { %v1171_v61 = vpop.f32.mrf.mxu1 }
 0x1d0   :  { %v589_v54 = vmax.f32 %v536_v51, 0.0  ;;  %v528_v55 = vadd.f32 %v1171_v61, %v356_v53  ;;  %v609_v61 = vld [vmem:[%s1202_s5] sm:$0xf] }
 0x1d1   :  { %v868_v63 = vpop.f32.mrf.mxu1 }
 0x1d2   :  { %v549_v39 = vadd.f32 %v868_v63, %v381_v28  ;;  %v588_v63 = vmax.f32 %v533_v48, 0.0 }
 0x1d3   :  { %v540_v0 = vpop.f32.mrf.mxu1 }
 0x1d4   :  { %v592_v49 = vmax.f32 %v549_v39, 0.0  ;;  %v541_v50 = vadd.f32 %v540_v0, %v371_v38  ;;  %v602_v60 = vpack.c.bf16 %v589_v54, %v588_v63 }
 0x1d5   :  { %v869_v1 = vpop.f32.mrf.mxu1 }
 0x1d6   :  { %v552_v35 = vadd.f32 %v869_v1, %v386_v24  ;;  %v590_v45 = vmax.f32 %v541_v50, 0.0  ;;  %v587_v1 = vmax.f32 %v528_v55, 0.0 }
 0x1d7   :  { %v543_v3 = vpop.f32.mrf.mxu1 }
 0x1d8   :  { %v593_v41 = vmax.f32 %v552_v35, 0.0  ;;  %v544_v42 = vadd.f32 %v543_v3, %v376_v34 }
 0x1d9   :  { %v872_v5 = vpop.f32.mrf.mxu1 }
 0x1da   :  { %v565_v25 = vadd.f32 %v872_v5, %v401_v9  ;;  %v604_v52 = vpack.c.bf16 %v593_v41, %v592_v49  ;;  %v591_v44 = vmax.f32 %v544_v42, 0.0  ;;  %v673_v9 = vld [vmem:[%s1197_s0 + $0x11] sm:$0x1] }
 0x1db   :  { %v556_v6 = vpop.f32.mrf.mxu1 }
 0x1dc   :  { %v596_v32 = vmax.f32 %v565_v25, 0.0  ;;  %v557_v33 = vadd.f32 %v556_v6, %v391_v16  ;;  %v603_v56 = vpack.c.bf16 %v591_v44, %v590_v45 }
 0x1dd   :  { %v873_v8 = vpop.f32.mrf.mxu1 }
 0x1de   :  { %v568_v21 = vadd.f32 %v873_v8, %v406_v7  ;;  %v594_v40 = vmax.f32 %v557_v33, 0.0 }
 0x1df   :  { %v559_v10 = vpop.f32.mrf.mxu1 }
 0x1e0   :  { %v597_v29 = vmax.f32 %v568_v21, 0.0  ;;  %v560_v30 = vadd.f32 %v559_v10, %v396_v13 }
 0x1e1   :  { %v876_v11 = vpop.f32.mrf.mxu1 }
 0x1e2   :  { %v581_v12 = vadd.f32 %v876_v11, %v421_v62  ;;  %v606_v36 = vpack.c.bf16 %v597_v29, %v596_v32  ;;  %v595_v37 = vmax.f32 %v560_v30, 0.0  ;;  %v351_v62 = vpop.permute.xlu0 %350 }
 0x1e3   :  { %v572_v14 = vpop.f32.mrf.mxu1  ;;  %v525_v0 = vadd.f32 %v1169_v59, %v351_v62 }
 0x1e4   :  { %v600_v15 = vmax.f32 %v581_v12, 0.0  ;;  %v573_v19 = vadd.f32 %v572_v14, %v411_v4  ;;  %v605_v43 = vpack.c.bf16 %v595_v37, %v594_v40 }
 0x1e5   :  { %v877_v17 = vpop.f32.mrf.mxu1 }
 0x1e6   :  { %v608_v18 = vpack.c.bf16 %v600_v15, %v600_v15  ;;  %v598_v26 = vmax.f32 %v573_v19, 0.0  ;;  %v614_v3 = vpop.permute.xlu0 %613 }
 0x1e7   :  { %v575_v20 = vpop.f32.mrf.mxu1 }
 0x1e8   :  { %v576_v22 = vadd.f32 %v575_v20, %v416_v2  ;;  %v620_v23 = vsel %vm486_vm2, %v608_v18, 0  ;;  %v586_v2 = vmax.f32 %v525_v0, 0.0 }
 0x1e9   :  { %879 = vmatpush3.bf16.msra.mxu0 %v620_v23 }
 0x1ea   :  { %v599_v27 = vmax.f32 %v576_v22, 0.0  ;;  %880 = vmatprep.subr.bf16.mxu0 %v948_v57  ;;  %v601_v58 = vpack.c.bf16 %v587_v1, %v586_v2 }
 0x1ec   :  { %v607_v31 = vpack.c.bf16 %v599_v27, %v598_v26 }
 0x1ee   :  { %881 = vmatpush3.bf16.msra.mxu0 %v607_v31 }
 0x1ef   :  { %882 = vmatprep.subr.bf16.mxu0 %v948_v57 }
 0x1f2   :  { %883 = vmatpush3.bf16.msra.mxu0 %v606_v36 }
 0x1f3   :  { %884 = vmatprep.subr.bf16.mxu0 %v948_v57 }
 0x1f6   :  { %885 = vmatpush3.bf16.msra.mxu0 %v605_v43 }
 0x1f7   :  { %886 = vmatprep.subr.bf16.mxu0 %v948_v57 }
 0x1fa   :  { %887 = vmatpush3.bf16.msra.mxu0 %v604_v52 }
 0x1fb   :  { %888 = vmatprep.subr.bf16.mxu0 %v948_v57 }
 0x1fe   :  { %889 = vmatpush3.bf16.msra.mxu0 %v603_v56 }
 0x1ff   :  { %890 = vmatprep.subr.bf16.mxu0 %v948_v57 }
 0x202   :  { %891 = vmatpush3.bf16.msra.mxu0 %v602_v60 }
 0x203   :  { %892 = vmatprep.subr.bf16.mxu0 %v948_v57  ;;  %v672_v57 = vld [vmem:[%s1197_s0 + $0x10] sm:$0x1]  ;;  %s950_s0 = smov [#allocation2]  }
 0x204   :  { %v713_v30 = vrot.slane %v672_v57, 7  ;;  %s752_s5 = sshll.u32 %s950_s0, 4  ;;  %s753_s5 = int_to_ptr.vmem [resolvable:$true] %s752_s5 }
 0x205   :  { %s925_s28 = scalar_lea.vmem %s753_s5, 16  ;;  %s929_s29 = scalar_lea.vmem %s753_s5, 32 }
 0x206   :  { %893 = vmatpush3.bf16.msra.mxu0 %v601_v58  ;;  %p926_p0 = scmp.ne.s32.totalorder %s753_s5, %s925_s28  ;;  %p930_p1 = scmp.lt.s32.totalorder %s753_s5, %s753_s5 }
 0x207   :  { %p931_p2 = scmp.lt.s32.totalorder %s929_s29, %s925_s28 }
 0x209   :  { %895 = vmatmul.mubr.msk.bf16.vlgmr.msra.gmra.mxu0 %vm461_vm1, %v609_v61  ;;  %p932_p3 = por %p931_p2, %p930_p1 }
 0x20b   :  { %p933_p4 = pnand %p932_p3, %p926_p0 }
 0x2c9   :  { %v656_v4 = vpop.f32.mrf.mxu0 }
 0x2ca   :  { %v657_v59 = vadd.f32 %v656_v4, %v614_v3 }
 0x2cb   :  { %v896_v5 = vpop.f32.mrf.mxu0 }
 0x2cc   :  { %921 = vtanh.f32 %v657_v59 }
 0x2cd   :  { %v659_v6 = vpop.f32.mrf.mxu0 }
 0x2cf   :  { %v897_v7 = vpop.f32.mrf.mxu0 }
 0x2d9   :  { %v922_v8 = vpop.eup %921 }
 0x2da   :  { %v668_v10 = vmul.f32 15.0, %v922_v8  ;;  %v675_v11 = vrot.slane %v922_v8, 4  ;;  %v682_v12 = vrot.slane %v922_v8, 6  ;;  %v665_v18 = vmul.f32 3.0, %v922_v8 }
 0x2db   :  { %v663_v24 = vmul.f32 1.5, %v922_v8  ;;  %v793_v34 = vadd.f32 -0.5, %v922_v8  ;;  %v670_v35 = vmul.f32 0.5, %v922_v8 }
 0x2dc   :  { %v677_v13 = vsub.f32 %v672_v57, %v675_v11  ;;  %v684_v14 = vsub.f32 %v673_v9, %v682_v12  ;;  %v669_v15 = vadd.f32 25.0, %v668_v10  ;;  %v666_v22 = vadd.f32 3.0, %v665_v18 }
 0x2dd   :  { %v664_v27 = vadd.f32 1.5, %v663_v24  ;;  %v671_v42 = vadd.f32 0.5, %v670_v35 }
 0x2de   :  { %v679_v16 = vrot.slane %v677_v13, 5  ;;  %v685_v17 = vmul.f32 30.0, %v684_v14  ;;  %v704_v26 = vrot.slane %v666_v22, 1  ;;  %v715_v37 = vmul.f32 %v713_v30, %v666_v22 }
 0x2df   :  { %v698_v31 = vmul.f32 %v672_v57, %v664_v27  ;;  %v731_v41 = vrot.slane %v684_v14, 3 }
 0x2e0   :  { %v681_v19 = vmul.f32 %v679_v16, %v669_v15  ;;  %v690_v21 = vrot.slane %v685_v17, 7  ;;  %v706_v28 = vsub.f32 %v664_v27, %v704_v26  ;;  %v717_v43 = vrot.slane %v715_v37, 7 }
 0x2e1   :  { %v700_v39 = vrot.slane %v698_v31, 6  ;;  %v733_v52 = vmul.f32 %v731_v41, %v671_v42 }
 0x2e2   :  { %v687_v20 = vrot.slane %v681_v19, 3  ;;  %v707_v29 = vmul.f32 %v706_v28, %v675_v11 }
 0x2e3   :  { %v702_v50 = vadd.f32 %v793_v34, %v700_v39  ;;  %v735_v53 = vrot.slane %v733_v52, 3 }
 0x2e4   :  { %v693_v23 = vsel %vm692_vm4, %v687_v20, %v690_v21  ;;  %v709_v32 = vrot.slane %v707_v29, 6 }
 0x2e5   :  { %v694_v25 = vmul.f32 0.5, %v693_v23 }
 0x2e6   :  { %v711_v40 = vadd.f32 %v793_v34, %v709_v32 }
 0x2e7   :  { %923 = vtanh.f32 %v694_v25 }
 0x2e8   :  { %v719_v46 = vadd.f32 %v717_v43, %v711_v40 }
 0x2f4   :  { %v924_v33 = vpop.eup %923 }
 0x2f5   :  { %v696_v36 = vmul.f32 0.5, %v924_v33 }
 0x2f7   :  { %v697_v38 = vadd.f32 0.5, %v696_v36 }
 0x2f9   :  { %v720_v47 = vsub.f32 1.0, %v697_v38  ;;  %v726_v49 = vrot.slane %v697_v38, 6  ;;  %v741_v56 = vrot.slane %v697_v38, 7 }
 0x2fb   :  { %v722_v51 = vrot.slane %v720_v47, 6  ;;  %v728_v48 = vmul.f32 %v726_v49, %v719_v46  ;;  %v738_v55 = vrot.slane %v720_v47, 7 }
 0x2fd   :  { %v724_v44 = vmul.f32 %v722_v51, %v702_v50 }
 0x2ff   :  { %v729_v45 = vadd.f32 %v728_v48, %v724_v44 }
 0x301   :  { %v737_v54 = vsub.f32 %v729_v45, %v735_v53  ;;  %v740_v62 = vmul.f32 %v738_v55, %v729_v45 }
 0x303   :  { %v743_v63 = vmul.f32 %v741_v56, %v737_v54 }
 0x305   :  { %v744_v0 = vadd.f32 %v743_v63, %v740_v62 }
 0x307   :  { %745 = vst [vmem:[#allocation2 - $0x2] sm:$0x4] %v744_v0 }
 0x308   :  { %936 = shalt.err (!%p933_p4)
}
 0x309   :  { %755 = dma.vmem_to_hbm [thread:$0]  %s753_s5, 16, %s1204_s7, [#allocation3]  }
 0x30a   :  { %945 = dma.done.wait [#allocation3], 16  }
 0x30b   :  { %946 = vsyncadd [#allocation3], 4294967280 }
 0x30c   :  { %759 = vsyncpa [#allocation3], 1 }

</bundles_post_ra>
